<compile_context>
chip_gen: v6e
topology: v6e:2x2x1
jax: 0.10.0
libtpu: 0.0.40
codegen_flags: <defaults>
</compile_context>

<pallas_src>
import jax
import jax.numpy as jnp
from jax.experimental import pallas as pl
from jax.experimental.pallas import tpu as pltpu


def _copy_kernel(x_ref, o_ref):
    # The channel-half swap is done by the BlockSpec index_map; the body is a
    # single VMEM pass-through copy (HBM-bandwidth bound).
    o_ref[...] = x_ref[...]


def _pick_row_tile(rows, max_rows):
    """Largest tile along the sublane-major axis: full dim if it fits,
    otherwise the biggest multiple-of-8 divisor of `rows` <= max_rows."""
    if rows <= max_rows:
        return rows  # block dim == full array dim -> always legal
    cap = max_rows - (max_rows % 8)
    for t in range(cap, 0, -8):
        if rows % t == 0:
            return t
    return rows  # no aligned divisor found; fall back to full dim


def tuple_flip(x, reverse=False):
    """Pallas implementation of TupleFlip.forward.

    forward(x)               -> (cat([b, a], dim=1), 0)
    forward(x, reverse=True) -> cat([b, a], dim=1)

    Swapping halves is an involution, so forward and reverse apply the same
    channel permutation (matching the PyTorch module exactly).
    """
    n, c, h, w = x.shape
    assert c % 2 == 0, "channel dim must be even for TupleFlip"

    half_flat = (c // 2) * h * w
    itemsize = jnp.dtype(x.dtype).itemsize

    if half_flat % 128 == 0:
        # Lane-dense path: view each channel-half as (rows, 128) so the last
        # block dim is exactly 128 lanes (unmasked full-width stores).
        rows = half_flat // 128
        # ~2 MiB per block -> <= ~8 MiB live with double-buffered in + out,
        # safe on v7x's smaller VMEM while staying near the HBM roofline.
        max_rows = max(8, (2 * 1024 * 1024) // (128 * itemsize))
        row_tile = _pick_row_tile(rows, max_rows)

        x_view = x.reshape(n, 2, rows, 128)
        view_shape = (n, 2, rows, 128)
        grid = (n, 2, rows // row_tile)
        block = (1, 1, row_tile, 128)
        # Input reads the *other* half (1 - j); output writes half j.
        in_spec = pl.BlockSpec(block, lambda i, j, t: (i, 1 - j, t, 0))
        out_spec = pl.BlockSpec(block, lambda i, j, t: (i, j, t, 0))
        dims = ("parallel", "parallel", "parallel")
    else:
        # Fallback: last two block dims equal the full array dims (always
        # legal), swap still expressed purely via the index_map.
        hw = h * w
        x_view = x.reshape(n, 2, c // 2, hw)
        view_shape = (n, 2, c // 2, hw)
        grid = (n, 2)
        block = (1, 1, c // 2, hw)
        in_spec = pl.BlockSpec(block, lambda i, j: (i, 1 - j, 0, 0))
        out_spec = pl.BlockSpec(block, lambda i, j: (i, j, 0, 0))
        dims = ("parallel", "parallel")

    out_view = pl.pallas_call(
        _copy_kernel,
        out_shape=jax.ShapeDtypeStruct(view_shape, x.dtype),
        grid_spec=pltpu.PrefetchScalarGridSpec(
            num_scalar_prefetch=0,
            grid=grid,
            in_specs=[in_spec],
            out_specs=out_spec,
        ),
        compiler_params=pltpu.CompilerParams(dimension_semantics=dims),
    )(x_view)

    out = out_view.reshape(n, c, h, w)
    if reverse:
        return out
    return out, 0


def _reference(x):
    a, b = jnp.split(x, 2, axis=1)
    return jnp.concatenate([b, a], axis=1)


if __name__ == "__main__":
    key = jax.random.PRNGKey(0)

    # Primary test: lane-dense path ((c//2)*h*w = 512, multiple of 128).
    x = jax.random.normal(key, (2, 4, 16, 16), dtype=jnp.float32)

    y, aux = tuple_flip(x, reverse=False)
    y = jax.block_until_ready(y)
    y_ref = _reference(x)
    assert aux == 0
    assert jnp.allclose(y, y_ref), "forward mismatch"

    y_rev = jax.block_until_ready(tuple_flip(x, reverse=True))
    assert jnp.allclose(y_rev, y_ref), "reverse mismatch"

    # Involution: applying twice recovers the input.
    y_twice, _ = tuple_flip(y, reverse=False)
    assert jnp.allclose(jax.block_until_ready(y_twice), x), "involution mismatch"

    # Fallback path test (half_flat = 48, not a multiple of 128).
    x2 = jax.random.normal(jax.random.PRNGKey(1), (2, 6, 4, 4), dtype=jnp.float32)
    y2, _ = tuple_flip(x2, reverse=False)
    assert jnp.allclose(jax.block_until_ready(y2), _reference(x2)), "fallback mismatch"

    print("KERNEL_OK")
</pallas_src>

<mosaic_0001>
module attributes {stable_mosaic.version = 11 : i64} {
  func.func @_copy_kernel(%arg0: i32, %arg1: i32, %arg2: i32, %arg3: memref<1x1x4x128xf32, #tpu.memory_space<vmem>>, %arg4: memref<1x1x4x128xf32, #tpu.memory_space<vmem>>) attributes {dimension_semantics = [#tpu.dimension_semantics<parallel>, #tpu.dimension_semantics<parallel>, #tpu.dimension_semantics<parallel>], iteration_bounds = array<i64: 2, 2, 1>, scalar_prefetch = 0 : i64, scratch_operands = 0 : i64, tpu.core_type = #tpu.core_type<tc>, window_params = [{transform_indices = @transform_0, window_bounds = array<i64: 1, 1, 4, 128>}, {transform_indices = @transform_1, window_bounds = array<i64: 1, 1, 4, 128>}]} {
    %c0 = arith.constant 0 : index
    %c0_0 = arith.constant 0 : index
    %c0_1 = arith.constant 0 : index
    %c0_2 = arith.constant 0 : index
    %0 = vector.load %arg3[%c0, %c0_0, %c0_1, %c0_2] : memref<1x1x4x128xf32, #tpu.memory_space<vmem>>, vector<1x1x4x128xf32>
    %c0_3 = arith.constant 0 : index
    %c0_4 = arith.constant 0 : index
    %c0_5 = arith.constant 0 : index
    %c0_6 = arith.constant 0 : index
    %1 = vector.load %arg4[%c0_3, %c0_4, %c0_5, %c0_6] : memref<1x1x4x128xf32, #tpu.memory_space<vmem>>, vector<1x1x4x128xf32>
    tpu.vector_store %arg4[%c0_3, %c0_4, %c0_5, %c0_6], %0 {strides = array<i32>} : memref<1x1x4x128xf32, #tpu.memory_space<vmem>>, vector<1x1x4x128xf32>,
    return
  }
  func.func @transform_0(%arg0: i32, %arg1: i32, %arg2: i32) -> (i32, i32, i32, i32) {
    %c1_i32 = arith.constant 1 : i32
    %0 = arith.subi %c1_i32, %arg1 : i32
    %c0_i32 = arith.constant 0 : i32
    %c0_i32_0 = arith.constant 0 : i32
    return %arg0, %0, %arg2, %c0_i32 : i32, i32, i32, i32
  }
  func.func @transform_1(%arg0: i32, %arg1: i32, %arg2: i32) -> (i32, i32, i32, i32) {
    %c0_i32 = arith.constant 0 : i32
    %c0_i32_0 = arith.constant 0 : i32
    return %arg0, %arg1, %arg2, %c0_i32 : i32, i32, i32, i32
  }
}

</mosaic_0001>

<bundles_post_ra>
// kernel: tpu_custom_call.1
= control target key start
LH: loop header
LB: loop body
LE: loop exit
PB: predicated region body
PF: predicated region fallthrough
CT: control target
= control target key end

     0   :  { %6 = vsyncpa [#allocation3], 0  ;;  %s755_s0 = inlined_call_operand.hbm [shape: f32[2,2,4,128], index: 0, kind: input, shape index: {}]   ;;  %s756_s1 = inlined_call_operand.hbm [shape: f32[2,2,4,128], index: 1, kind: output, shape index: {}]  }
   0x1   :  { %8 = vsyncpa [#allocation3 + $0x1], 0 }
   0x2   :  { %9 = vsyncpa [#allocation4], 0 }
   0x3   :  { %11 = vsyncpa [#allocation4 + $0x1], 0  ;;  %s554_s6 = smov 0   ;;  %s556_s7 = smov 0  }
   0x4   :  { %s558_s8 = smov 0   ;;  %s560_s9 = smov 0  }
   0x5   :  { %s562_s10 = smov 0   ;;  %s564_s11 = smov 0  }
   0x6   :  { %s566_s12 = smov 0   ;;  %s568_s13 = smov 0  }
   0x7   :  { %s570_s14 = smov 0   ;;  %s572_s15 = smov 0  }
   0x8   :  { %s574_s16 = smov 0  }
   0x9 LB: > { %s275_s17 = sadd.s32 4294967295, %s540_s16   ;;  %s276_s18 = sadd.s32 4294967294, %s540_s16   ;;  %s540_s16 = sphi %s574_s16, %s17_s16   ;;  %s536_s15 = sphi %s572_s15, %s778_s15   ;;  %s532_s14 = sphi %s570_s14, %s777_s14   ;;  %s528_s13 = sphi %s568_s13, %s776_s13   ;;  %s524_s12 = sphi %s566_s12, %s775_s12   ;;  %s520_s11 = sphi %s564_s11, %s774_s11   ;;  %s516_s10 = sphi %s562_s10, %s773_s10   ;;  %s512_s9 = sphi %s560_s9, %s772_s9   ;;  %s508_s8 = sphi %s558_s8, %s771_s8   ;;  %s504_s7 = sphi %s556_s7, %s770_s7   ;;  %s500_s6 = sphi %s554_s6, %s769_s6  }
   0xa   : > { %s32_s19 = sadd.s32 1, %s532_s14  ;;  %s36_s20 = sadd.s32 1, %s536_s15 }
   0xb   : > { %p34_p0 = scmp.ge.s32.totalorder %s32_s19, 2  ;;  %s40_s21 = ssub.s32 1, %s532_s14 }
   0xc   : > { %s49_s22 = sadd.s32 1, %s520_s11  ;;  %p56_p1 = scmp.ne.s32.totalorder %s520_s11, %s516_s10 }
   0xd   : > { %s780_s19 = smov (%p34_p0, %s32_s19), 0  ;;  %s782_s20 = smov (!%p34_p0, %s36_s20), %s536_s15 }
   0xe   : > { %759 = sst [smem:[#allocation8_spill]] %s780_s19  ;;  %s41_s23 = ssub.s32 1, %s780_s19 }
   0xf   : > { %p57_p2 = scmp.eq.s32.totalorder %s540_s16, 0  ;;  %p38_p3 = scmp.ge.s32.totalorder %s782_s20, 2 }
  0x10   : > { %s43_s24 = ssub.s32 %s40_s21, %s41_s23  ;;  %p62_p5 = scmp.ne.s32.totalorder %s516_s10, %s512_s9 }
  0x11   : > { %p624_p4 = por %p57_p2, %p56_p1  ;;  %s784_s20 = smov (%p38_p3, %s782_s20), 0 }
  0x12   : > { %761 = sst [smem:[#allocation9_spill]] %s784_s20  ;;  %p63_p6 = scmp.eq.s32.totalorder %s275_s17, 0 }
  0x13   : > { %s73_s26 = ssub.s32 %s532_s14, %s780_s19  ;;  %s42_s27 = ssub.s32 %s536_s15, %s784_s20 }
  0x14   : > { %s79_s28 = sadd.s32 1, %s508_s8  ;;  %s44_s29 = sor.u32 %s43_s24, %s42_s27 }
  0x15   : > { %p639_p7 = por %p63_p6, %p62_p5  ;;  %p47_p8 = scmp.eq.s32.totalorder %s44_s29, 0 }
  0x16   : > { %s74_s2 = sor.u32 %s73_s26, %s42_s27  ;;  %p89_p10 = scmp.ne.s32.totalorder %s508_s8, %s504_s7 }
  0x17   : > { %p77_p9 = scmp.eq.s32.totalorder %s74_s2, 0  ;;  %p90_p11 = scmp.eq.s32.totalorder %s275_s17, 3 }
  0x18   : > { %s646_s3 = scalar_select %p47_p8, %s520_s11, %s49_s22  }
  0x19   : > { %s649_s4 = scalar_select %p77_p9, %s508_s8, %s79_s28  }
  0x1a   : > { %p95_p12 = scmp.ne.s32.totalorder %s504_s7, %s500_s6  ;;  %p96_p13 = scmp.eq.s32.totalorder %s276_s18, 3 }
  0x1b   : > { %p657_p0 = por %p90_p11, %p89_p10  ;;  %p302_p1 = scmp.lt.s32.totalorder %s540_s16, 4 }
  0x1c   : > { %p662_p2 = por %p96_p13, %p95_p12  ;;  %s116_s22 = sand.u32 1, %s520_s11  }
  0x1d   : > { %s279_s23 = sshll.u32 %s116_s22, 2  ;;  %s280_s24 = sshll.u32 %s536_s15, 1 }
  0x1e   : > { %s764_s9 = scalar_select %p662_p2, 1, 0 }
  0x1f   : > { %s127_s26 = sadd.s32 %s280_s24, %s40_s21  ;;  %s120_s17 = scalar_lea.vmem [#allocation2], %s279_s23 }
  0x20   : > { %s131_s27 = sshll.u32 %s120_s17, 4  ;;  %s281_s28 = sshll.u32 %s127_s26, 6  ;;  %s132_s27 = int_to_ptr.vmem [resolvable:$true] %s131_s27 }
  0x21   : > { %s129_s2 = scalar_lea.hbm %s755_s0, %s281_s28  ;;  %p675_p3 = pnand %p302_p1, %p624_p4 }
  0x22   : > { %p282_p5 = scmp.ge.s32.totalorder %s540_s16, 1  ;;  %p136_p6 = scmp.lt.s32.totalorder %s540_s16, 5 }
  0x23   : > { %s117_s19 = scalar_lea.sflag [#allocation3], %s116_s22  ;;  %p394_p8 = pneg %p675_p3 }
  0x24   : > { %s405_s21 = scalar_lea.vmem %s132_s27, 64  ;;  %s542_s23 = smov [#allocation2]  }
  0x25   : > { %p406_p9 = scmp.ne.s32.totalorder %s132_s27, %s405_s21  ;;  %s410_s24 = sshll.u32 %s542_s23, 4  ;;  %s411_s24 = int_to_ptr.vmem [resolvable:$false] %s410_s24 }
  0x26   : > { %s412_s26 = scalar_lea.vmem %s411_s24, 128  ;;  %p413_p12 = scmp.lt.s32.totalorder %s132_s27, %s411_s24 }
  0x27   : > { %p408_p10 = pnand %p406_p9, %p394_p8  ;;  %p414_p13 = scmp.lt.s32.totalorder %s412_s26, %s405_s21 }
  0x29   : > { %p409_p11 = pneg %p408_p10  ;;  %p415_p4 = por %p414_p13, %p413_p12 }
  0x2b   : > { %p416_p1 = pnand %p415_p4, %p409_p11 }
  0x2d   : > { %419 = shalt.err (!%p416_p1)
}
  0x2e   : > { %297 = dma.hbm_to_vmem [thread:$0]  (!%p675_p3), %s129_s2, 64, %s132_s27, %s117_s19  }
  0x2f   : > { %p137_p2 = pnand %p282_p5, %p136_p6 }
  0x30   : > { %s142_s25 = sand.u32 (!%p137_p2), 1, %s516_s10  }
  0x31   : > { %140 = sbr.rel (%p137_p2) target bundleno = 81 (0x51), region = 24  ;;  %s283_s22 = sshll.u32 (!%p137_p2), %s142_s25, 2 }
  0x32   : > { %s143_s17 = scalar_lea.sflag (!%p137_p2), [#allocation3], %s142_s25  ;;  %s146_s28 = scalar_lea.vmem (!%p137_p2), [#allocation2], %s283_s22 }
  0x36   : > { %491 = dma.done.wait (%p639_p7), %s143_s17, 64  }
  0x37   : > { %493 = vsyncadd (%p639_p7), %s143_s17, 4294967232  ;;  %s162_s19 = sand.u32 1, %s504_s7   ;;  %s286_s20 = sshll.u32 %s528_s13, 1  ;;  %v166_v0 = vld [vmem:[%s146_s28] sm:$0xf] }
  0x38   : > { %s284_s27 = sshll.u32 %s162_s19, 2  ;;  %s181_s29 = sadd.s32 %s524_s12, %s286_s20 }
  0x39   : > { %s164_s18 = scalar_lea.vmem [#allocation5], %s284_s27  ;;  %s287_s21 = sshll.u32 %s181_s29, 6 }
  0x3a   : > { %s185_s2 = sshll.u32 %s164_s18, 4  ;;  %s183_s30 = scalar_lea.hbm %s756_s1, %s287_s21  ;;  %167 = vst [vmem:[%s164_s18] sm:$0xf] %v166_v0  ;;  %s697_s2 = int_to_ptr.vmem [resolvable:$true] %s185_s2 }
  0x3b   : > { %s169_s26 = scalar_lea.sflag [#allocation4], %s162_s19  ;;  %s420_s25 = scalar_lea.vmem %s697_s2, 64 }
  0x3c   : > { %p421_p7 = scmp.ne.s32.totalorder %s697_s2, %s420_s25  ;;  %s543_s12 = smov [#allocation5]  }
  0x3d   : > { %s424_s13 = sshll.u32 %s543_s12, 4  ;;  %s425_s13 = int_to_ptr.vmem [resolvable:$false] %s424_s13 }
  0x3e   : > { %p422_p2 = pnand %p421_p7, %p657_p0  ;;  %s426_s22 = scalar_lea.vmem %s425_s13, 128 }
  0x3f   : > { %p427_p5 = scmp.lt.s32.totalorder %s697_s2, %s425_s13  ;;  %p428_p6 = scmp.lt.s32.totalorder %s426_s22, %s420_s25 }
  0x40   : > { %p423_p3 = pneg %p422_p2 }
  0x41   : > { %p429_p8 = por %p428_p6, %p427_p5 }
  0x43   : > { %p430_p9 = pnand %p429_p8, %p423_p3 }
  0x45   : > { %433 = shalt.err (!%p430_p9)
}
  0x46   : > { %s434_s17 = scalar_lea.hbm %s183_s30, 64  ;;  %s438_s20 = scalar_lea.hbm %s756_s1, 256 }
  0x47   : > { %p435_p10 = scmp.ne.s32.totalorder %s183_s30, %s434_s17  ;;  %p439_p13 = scmp.lt.s32.totalorder %s183_s30, %s756_s1 }
  0x48   : > { %p440_p4 = scmp.lt.s32.totalorder %s438_s20, %s434_s17 }
  0x49   : > { %p436_p11 = pnand %p435_p10, %p657_p0 }
  0x4a   : > { %p441_p1 = por %p440_p4, %p439_p13 }
  0x4b   : > { %p437_p12 = pneg %p436_p11 }
  0x4d   : > { %p442_p7 = pnand %p441_p1, %p437_p12 }
  0x4f   : > { %445 = shalt.err (!%p442_p7)
}
  0x50   : > { %292 = dma.vmem_to_hbm [thread:$0]  (%p657_p0), %s697_s2, 64, %s183_s30, %s169_s26  }
  0x51 PF: > { %p303_p2 = scmp.ge.s32.totalorder %s540_s16, 2  ;;  %s197_s18 = sand.u32 1, %s500_s6  }
  0x52   : > { %p766_p3 = scmp.ne.s32.totalorder %s764_s9, 0  ;;  %s198_s21 = scalar_lea.sflag [#allocation4], %s197_s18 }
  0x54   : > { %p299_p5 = pnand %p303_p2, %p766_p3 }
  0x56   : > { %p300_p6 = pneg %p299_p5 }
  0x58   : > { %495 = dma.done.wait (%p300_p6), %s198_s21, 64  }
  0x59   : > { %497 = vsyncadd (%p300_p6), %s198_s21, 4294967232  ;;  %s17_s16 = sadd.s32 1, %s540_s16   ;;  %s767_s5 = sld [smem:[#allocation8_spill]] }
  0x5a   : > { %p14_p8 = scmp.ge.s32.totalorder %s17_s16, 6   ;;  %s768_s2 = sld [smem:[#allocation9_spill]] }
  0x5b   : > { %s769_s6 = smov %s504_s7  ;;  %s770_s7 = smov %s508_s8 }
  0x5c   : > { %s771_s8 = smov %s649_s4  ;;  %s772_s9 = smov %s516_s10 }
  0x5d   : > { %s773_s10 = smov %s520_s11  ;;  %s774_s11 = smov %s646_s3 }
  0x5e   : > { %s775_s12 = smov %s532_s14  ;;  %s776_s13 = smov %s536_s15 }
  0x5f   : > { %s777_s14 = smov %s767_s5  ;;  %16 = sbr.rel (!%p14_p8) target bundleno = 9 (0x9), region = 69 }
  0x60   : > { %s778_s15 = smov %s768_s2 }
  0x64   :  { %203 = vsyncpa [#allocation3], 1 }
  0x65   :  { %205 = vsyncpa [#allocation3 + $0x1], 1 }
  0x66   :  { %206 = vsyncpa [#allocation4], 1 }
  0x67   :  { %208 = vsyncpa [#allocation4 + $0x1], 1 }

</bundles_post_ra>
